<compile_context>
chip_gen: v7x
topology: tpu7x:2x2x1
jax: 0.10.0
libtpu: 0.0.40
codegen_flags: <defaults>
</compile_context>

<pallas_src>
import jax
import jax.numpy as jnp
from jax.experimental import pallas as pl
from jax.experimental.pallas import tpu as pltpu

LN_EPS = 1e-12


def bert_embeddings_kernel(x_ref, w_ref, pos_ref, tok_ref, gamma_ref, beta_ref, o_ref):
    # x_ref:   (bb, ts, V)  input rows for this (seq-tile, batch-tile) grid point
    # w_ref:   (V, H)       word-embedding projection (Linear weight^T), resident
    # pos_ref: (ts, H)      position rows for this seq tile (shared across bb)
    # tok_ref: (1, H)       token-type-0 embedding row, resident
    # gamma_ref/beta_ref: (1, H) f32 LayerNorm affine params, resident
    # o_ref:   (bb, ts, H)
    emb = jnp.einsum("btv,vh->bth", x_ref[...], w_ref[...],
                     preferred_element_type=jnp.float32)             # MXU, f32 acc
    emb = emb + pos_ref[...].astype(jnp.float32)[None]               # broadcast over bb
    emb = emb + tok_ref[...].astype(jnp.float32)[None]               # token-type 0 row

    # One-pass LayerNorm statistics over the hidden dim (biased var, torch LN).
    mu = jnp.mean(emb, axis=-1, keepdims=True)
    ms = jnp.mean(emb * emb, axis=-1, keepdims=True)
    var = jnp.maximum(ms - mu * mu, 0.0)
    inv = jax.lax.rsqrt(var + LN_EPS)
    o_ref[...] = ((emb - mu) * inv * gamma_ref[...] + beta_ref[...]).astype(o_ref.dtype)


def _seq_tile(S, target=512):
    """Sequence tile height. Full S when small; otherwise the largest divisor
    of S <= target that is a multiple of 16 (bf16 sublane packing) or 8, so the
    (8,128) BlockSpec rule always holds and stores stay unmasked."""
    if S <= target:
        return S                       # full-dim block: always BlockSpec-legal
    for step in (16, 8):
        for ts in range(target, step - 1, -step):   # multiples of `step`
            if S % ts == 0:
                return ts
    # TODO(synk): ragged S > 512 with no 8-aligned divisor needs a cdiv grid +
    # @pl.when-masked tail tile; fall back to one full-length (legal) tile.
    return S


def _batch_tile(B, ts, H, target_step_bytes=4 << 20, out_bytes=2):
    """Batch tile so each grid step writes ~target_step_bytes of output,
    amortizing the ~0.35us fixed per-step cost (largest review lever)."""
    row_bytes = ts * H * out_bytes
    cap = max(1, target_step_bytes // row_bytes)
    bb = 1
    for d in range(1, B + 1):
        if B % d == 0 and d <= cap:
            bb = d
    return bb


def init_params(key, vocab_size, hidden_size, max_pos, type_vocab,
                dtype=jnp.bfloat16):
    k1, k2, k3 = jax.random.split(key, 3)
    std = 0.02
    return {
        # nn.Linear(vocab, hidden).weight is (H, V); store transposed (V, H)
        "word_w": (jax.random.normal(k1, (vocab_size, hidden_size), jnp.float32) * std).astype(dtype),
        "pos_table": (jax.random.normal(k2, (max_pos, hidden_size), jnp.float32) * std).astype(dtype),
        "tok_table": (jax.random.normal(k3, (type_vocab, hidden_size), jnp.float32) * std).astype(dtype),
        # Stored pre-shaped (1, H) f32 so no per-call reshape/cast op is needed.
        "ln_w": jnp.ones((1, hidden_size), jnp.float32),
        "ln_b": jnp.zeros((1, hidden_size), jnp.float32),
    }


def bert_embeddings(input_ids, params, token_type_ids=None):
    """input_ids: (B, S, V) float tensor. Returns (B, S, H)."""
    if token_type_ids is not None:
        # TODO(synk): non-default token_type_ids needs a per-(b,s) gather of
        # tok_table; only the module default (zeros -> row 0) is implemented.
        raise NotImplementedError("only token_type_ids=None (default) is supported")

    B, S, V = input_ids.shape
    word_w = params["word_w"]                     # (V, H) bf16
    H = word_w.shape[1]
    act_dtype = word_w.dtype

    pos_table = params["pos_table"]               # (max_pos, H) bf16
    tok_row = params["tok_table"][:1]             # (1, H): one-row slice, negligible
    gamma = params["ln_w"]                        # (1, H) f32
    beta = params["ln_b"]                         # (1, H) f32

    ts = _seq_tile(S)
    bb = _batch_tile(B, ts, H)
    # v7x shards "parallel" grid axes over its 2 TensorCores; avoid collapsing
    # the whole call into a single grid step when the sequence can be split
    # into two aligned tiles (no-op on 1-TC v5e/v6e, trivial extra step).
    if B // bb == 1 and S // ts == 1 and ts >= 16 and (ts // 2) % 8 == 0:
        ts //= 2

    if ts % 8 == 0:
        # Tile the full table straight from HBM; BlockSpec DMAs only rows < S.
        pos_arg = pos_table
    else:
        # Small/odd S: ts == S equals the sliced array's full dim (legal block).
        pos_arg = pos_table[:S]

    # Batch innermost: pos tile index is constant across it (re-DMA skipped);
    # word_w / tok / gamma / beta use constant index maps (DMA'd once).
    grid = (S // ts, B // bb)

    out = pl.pallas_call(
        bert_embeddings_kernel,
        out_shape=jax.ShapeDtypeStruct((B, S, H), act_dtype),
        grid_spec=pltpu.PrefetchScalarGridSpec(
            num_scalar_prefetch=0,
            grid=grid,
            in_specs=[
                pl.BlockSpec((bb, ts, V), lambda s, b: (b, s, 0)),   # x rows
                pl.BlockSpec((V, H), lambda s, b: (0, 0)),           # word_w
                pl.BlockSpec((ts, H), lambda s, b: (s, 0)),          # pos rows
                pl.BlockSpec((1, H), lambda s, b: (0, 0)),           # tok row 0
                pl.BlockSpec((1, H), lambda s, b: (0, 0)),           # gamma
                pl.BlockSpec((1, H), lambda s, b: (0, 0)),           # beta
            ],
            out_specs=pl.BlockSpec((bb, ts, H), lambda s, b: (b, s, 0)),
        ),
        compiler_params=pltpu.CompilerParams(
            # No reduction axis -> both axes parallel (lets v7x use both TCs).
            dimension_semantics=("parallel", "parallel"),
            # Larger batched tiles (bf16 streams + f32 LN intermediates) need
            # more than the 16/32 MiB default scoped VMEM on v5e/v6e; 48 MiB
            # stays under v7x's 64 MiB physical budget.
            vmem_limit_bytes=48 * 1024 * 1024,
        ),
    )(input_ids, word_w, pos_arg, tok_row, gamma, beta)

    return out


if __name__ == "__main__":
    # Config values from config0 (vocab=69, hidden=768); small batch/seq demo.
    B, S = 2, 8
    VOCAB, HIDDEN = 69, 768
    MAX_POS, TYPE_VOCAB = 512, 2

    key = jax.random.PRNGKey(0)
    kp, kx = jax.random.split(key)
    params = init_params(kp, VOCAB, HIDDEN, MAX_POS, TYPE_VOCAB)

    # The PyTorch module's Linear consumes a float (B, S, vocab) tensor;
    # build a one-hot-like float input (exact in bf16).
    ids = jax.random.randint(kx, (B, S), 0, VOCAB)
    input_ids = jax.nn.one_hot(ids, VOCAB, dtype=jnp.bfloat16)

    out = jax.block_until_ready(bert_embeddings(input_ids, params))

    # Pure-JAX f32 reference from the same (bf16-stored) parameters.
    x32 = input_ids.astype(jnp.float32).reshape(B * S, VOCAB)
    ref = (x32 @ params["word_w"].astype(jnp.float32)).reshape(B, S, HIDDEN)
    ref = ref + params["pos_table"][:S].astype(jnp.float32)[None]
    ref = ref + params["tok_table"][0].astype(jnp.float32)[None, None]
    mu = ref.mean(-1, keepdims=True)
    var = ((ref - mu) ** 2).mean(-1, keepdims=True)
    ref = (ref - mu) / jnp.sqrt(var + LN_EPS)
    ref = ref * params["ln_w"].astype(jnp.float32) + params["ln_b"].astype(jnp.float32)

    assert out.shape == (B, S, HIDDEN)
    err = float(jnp.max(jnp.abs(out.astype(jnp.float32) - ref)))
    # Everything upstream of the store is f32 and matches the reference; the
    # only error left is the bf16 output rounding: <= ~1 ulp at |z| in [2, 8)
    # after LayerNorm, i.e. <= ~0.016.  3e-2 leaves ~2x margin.
    assert err < 3e-2, f"max abs err {err}"

    print("KERNEL_OK")
</pallas_src>

<mosaic_0001>
module attributes {stable_mosaic.version = 11 : i64} {
  func.func @bert_embeddings_kernel(%arg0: i32, %arg1: i32, %arg2: memref<2x8x69xbf16, #tpu.memory_space<vmem>>, %arg3: memref<69x768xbf16, #tpu.memory_space<vmem>>, %arg4: memref<8x768xbf16, #tpu.memory_space<vmem>>, %arg5: memref<1x768xbf16, #tpu.memory_space<vmem>>, %arg6: memref<1x768xf32, #tpu.memory_space<vmem>>, %arg7: memref<1x768xf32, #tpu.memory_space<vmem>>, %arg8: memref<2x8x768xbf16, #tpu.memory_space<vmem>>) attributes {dimension_semantics = [#tpu.dimension_semantics<parallel>, #tpu.dimension_semantics<parallel>], iteration_bounds = array<i64: 1, 1>, scalar_prefetch = 0 : i64, scratch_operands = 0 : i64, tpu.core_type = #tpu.core_type<tc>, window_params = [{transform_indices = @transform_0, window_bounds = array<i64: 2, 8, 69>}, {pipeline_mode = #tpu.pipeline_mode<synchronous>, transform_indices = @transform_1, window_bounds = array<i64: 69, 768>}, {transform_indices = @transform_2, window_bounds = array<i64: 8, 768>}, {pipeline_mode = #tpu.pipeline_mode<synchronous>, transform_indices = @transform_3, window_bounds = array<i64: 1, 768>}, {pipeline_mode = #tpu.pipeline_mode<synchronous>, transform_indices = @transform_4, window_bounds = array<i64: 1, 768>}, {pipeline_mode = #tpu.pipeline_mode<synchronous>, transform_indices = @transform_5, window_bounds = array<i64: 1, 768>}, {transform_indices = @transform_6, window_bounds = array<i64: 2, 8, 768>}]} {
    %c0 = arith.constant 0 : index
    %c0_0 = arith.constant 0 : index
    %c0_1 = arith.constant 0 : index
    %0 = vector.load %arg2[%c0, %c0_0, %c0_1] : memref<2x8x69xbf16, #tpu.memory_space<vmem>>, vector<2x8x69xbf16>
    %c0_2 = arith.constant 0 : index
    %c0_3 = arith.constant 0 : index
    %1 = vector.load %arg3[%c0_2, %c0_3] : memref<69x768xbf16, #tpu.memory_space<vmem>>, vector<69x768xbf16>
    "tpu.trace_start"() <{level = 10 : i32, message = "btv,vh->bth"}> : () -> ()
    %cst = arith.constant dense<0.000000e+00> : vector<2x8x768xf32>
    %2 = tpu.matmul %0, %1, %cst {dimension_numbers = #tpu.dot_dimension_numbers<[2], [0], [0, 1], [1], [0, 0, 0, 1, 1, 1], [], []>} : vector<2x8x69xbf16>, vector<69x768xbf16>, vector<2x8x768xf32> -> vector<2x8x768xf32>
    "tpu.trace_stop"() : () -> ()
    %c0_4 = arith.constant 0 : index
    %c0_5 = arith.constant 0 : index
    %3 = vector.load %arg4[%c0_4, %c0_5] : memref<8x768xbf16, #tpu.memory_space<vmem>>, vector<8x768xbf16>
    %4 = arith.extf %3 : vector<8x768xbf16> to vector<8x768xf32>
    %5 = vector.shape_cast %4 : vector<8x768xf32> to vector<1x8x768xf32>
    %6 = vector.broadcast %5 : vector<1x8x768xf32> to vector<2x8x768xf32>
    %7 = arith.addf %2, %6 : vector<2x8x768xf32>
    %c0_6 = arith.constant 0 : index
    %c0_7 = arith.constant 0 : index
    %8 = vector.load %arg5[%c0_6, %c0_7] : memref<1x768xbf16, #tpu.memory_space<vmem>>, vector<1x768xbf16>
    %9 = arith.extf %8 : vector<1x768xbf16> to vector<1x768xf32>
    %10 = vector.shape_cast %9 : vector<1x768xf32> to vector<1x1x768xf32>
    %11 = vector.broadcast %10 : vector<1x1x768xf32> to vector<2x8x768xf32>
    %12 = arith.addf %7, %11 : vector<2x8x768xf32>
    %cst_8 = arith.constant dense<0.000000e+00> : vector<2x8xf32>
    %13 = vector.multi_reduction <add>, %12, %cst_8 [2] : vector<2x8x768xf32> to vector<2x8xf32>
    %14 = vector.shape_cast %13 : vector<2x8xf32> to vector<2x8x1xf32>
    %cst_9 = arith.constant 7.680000e+02 : f32
    %15 = vector.broadcast %cst_9 : f32 to vector<2x8x1xf32>
    %16 = arith.divf %14, %15 : vector<2x8x1xf32>
    %17 = arith.mulf %12, %12 : vector<2x8x768xf32>
    %cst_10 = arith.constant dense<0.000000e+00> : vector<2x8xf32>
    %18 = vector.multi_reduction <add>, %17, %cst_10 [2] : vector<2x8x768xf32> to vector<2x8xf32>
    %19 = vector.shape_cast %18 : vector<2x8xf32> to vector<2x8x1xf32>
    %cst_11 = arith.constant 7.680000e+02 : f32
    %20 = vector.broadcast %cst_11 : f32 to vector<2x8x1xf32>
    %21 = arith.divf %19, %20 : vector<2x8x1xf32>
    %22 = arith.mulf %16, %16 : vector<2x8x1xf32>
    %23 = arith.subf %21, %22 : vector<2x8x1xf32>
    %cst_12 = arith.constant 0.000000e+00 : f32
    %24 = vector.broadcast %cst_12 : f32 to vector<2x8x1xf32>
    %25 = arith.maximumf %23, %24 : vector<2x8x1xf32>
    %cst_13 = arith.constant 9.99999996E-13 : f32
    %26 = vector.broadcast %cst_13 : f32 to vector<2x8x1xf32>
    %27 = arith.addf %25, %26 : vector<2x8x1xf32>
    %28 = math.rsqrt %27 : vector<2x8x1xf32>
    %29 = vector.broadcast %16 : vector<2x8x1xf32> to vector<2x8x768xf32>
    %30 = arith.subf %12, %29 : vector<2x8x768xf32>
    %31 = vector.broadcast %28 : vector<2x8x1xf32> to vector<2x8x768xf32>
    %32 = arith.mulf %30, %31 : vector<2x8x768xf32>
    %c0_14 = arith.constant 0 : index
    %c0_15 = arith.constant 0 : index
    %33 = vector.load %arg6[%c0_14, %c0_15] : memref<1x768xf32, #tpu.memory_space<vmem>>, vector<1x768xf32>
    %34 = vector.shape_cast %33 : vector<1x768xf32> to vector<1x1x768xf32>
    %35 = vector.broadcast %34 : vector<1x1x768xf32> to vector<2x8x768xf32>
    %36 = arith.mulf %32, %35 : vector<2x8x768xf32>
    %c0_16 = arith.constant 0 : index
    %c0_17 = arith.constant 0 : index
    %37 = vector.load %arg7[%c0_16, %c0_17] : memref<1x768xf32, #tpu.memory_space<vmem>>, vector<1x768xf32>
    %38 = vector.shape_cast %37 : vector<1x768xf32> to vector<1x1x768xf32>
    %39 = vector.broadcast %38 : vector<1x1x768xf32> to vector<2x8x768xf32>
    %40 = arith.addf %36, %39 : vector<2x8x768xf32>
    %41 = arith.truncf %40 : vector<2x8x768xf32> to vector<2x8x768xbf16>
    %c0_18 = arith.constant 0 : index
    %c0_19 = arith.constant 0 : index
    %c0_20 = arith.constant 0 : index
    %42 = vector.load %arg8[%c0_18, %c0_19, %c0_20] : memref<2x8x768xbf16, #tpu.memory_space<vmem>>, vector<2x8x768xbf16>
    tpu.vector_store %arg8[%c0_18, %c0_19, %c0_20], %41 {strides = array<i32>} : memref<2x8x768xbf16, #tpu.memory_space<vmem>>, vector<2x8x768xbf16>,
    return
  }
  func.func @transform_0(%arg0: i32, %arg1: i32) -> (i32, i32, i32) {
    %c0_i32 = arith.constant 0 : i32
    %c0_i32_0 = arith.constant 0 : i32
    return %arg1, %arg0, %c0_i32 : i32, i32, i32
  }
  func.func @transform_1(%arg0: i32, %arg1: i32) -> (i32, i32) {
    %c0_i32 = arith.constant 0 : i32
    %c0_i32_0 = arith.constant 0 : i32
    %c0_i32_1 = arith.constant 0 : i32
    return %c0_i32, %c0_i32_0 : i32, i32
  }
  func.func @transform_2(%arg0: i32, %arg1: i32) -> (i32, i32) {
    %c0_i32 = arith.constant 0 : i32
    %c0_i32_0 = arith.constant 0 : i32
    return %arg0, %c0_i32 : i32, i32
  }
  func.func @transform_3(%arg0: i32, %arg1: i32) -> (i32, i32) {
    %c0_i32 = arith.constant 0 : i32
    %c0_i32_0 = arith.constant 0 : i32
    %c0_i32_1 = arith.constant 0 : i32
    return %c0_i32, %c0_i32_0 : i32, i32
  }
  func.func @transform_4(%arg0: i32, %arg1: i32) -> (i32, i32) {
    %c0_i32 = arith.constant 0 : i32
    %c0_i32_0 = arith.constant 0 : i32
    %c0_i32_1 = arith.constant 0 : i32
    return %c0_i32, %c0_i32_0 : i32, i32
  }
  func.func @transform_5(%arg0: i32, %arg1: i32) -> (i32, i32) {
    %c0_i32 = arith.constant 0 : i32
    %c0_i32_0 = arith.constant 0 : i32
    %c0_i32_1 = arith.constant 0 : i32
    return %c0_i32, %c0_i32_0 : i32, i32
  }
  func.func @transform_6(%arg0: i32, %arg1: i32) -> (i32, i32, i32) {
    %c0_i32 = arith.constant 0 : i32
    %c0_i32_0 = arith.constant 0 : i32
    return %arg1, %arg0, %c0_i32 : i32, i32, i32
  }
}

</mosaic_0001>

<bundles_post_ra>
// kernel: tpu_custom_call.1
= control target key start
LH: loop header
LB: loop body
LE: loop exit
PB: predicated region body
PF: predicated region fallthrough
CT: control target
= control target key end

     0   :  { %11 = vsyncpa [#allocation3], 0  ;;  %s1132_s0 = inlined_call_operand.hbm [shape: bf16[2,8,69], index: 0, kind: input, shape index: {}]   ;;  %s1133_s1 = inlined_call_operand.hbm [shape: bf16[69,768], index: 1, kind: input, shape index: {}]   ;;  %s1134_s2 = inlined_call_operand.hbm [shape: bf16[512,768], index: 2, kind: input, shape index: {}]   ;;  %s1135_s3 = inlined_call_operand.vmem [shape: bf16[1,768], index: 3, kind: input, shape index: {}]   ;;  %s1136_s4 = inlined_call_operand.vmem [shape: f32[1,768], index: 4, kind: input, shape index: {}]   ;;  %s1137_s5 = inlined_call_operand.vmem [shape: f32[1,768], index: 5, kind: input, shape index: {}]   ;;  %s1138_s6 = inlined_call_operand.hbm [shape: bf16[2,8,768], index: 6, kind: output, shape index: {}]  }
   0x1   :  { %12 = vsyncpa [#allocation6], 0 }
   0x2   :  { %13 = vsyncpa [#allocation4], 0  ;;  %s904_s21 = smov [#allocation5]   ;;  %s810_s25 = scalar_lea.hbm %s1133_s1, 3456 }
   0x3   :  { %s31_s22 = sshll.u32 %s904_s21, 4  ;;  %p811_p0 = scmp.ne.s32.totalorder %s1133_s1, %s810_s25  ;;  %s32_s22 = int_to_ptr.vmem [resolvable:$true] %s31_s22 }
   0x4   :  { %p814_p1 = scmp.lt.u32.totalorder %s810_s25, %s1133_s1 }
   0x6   :  { %p816_p2 = pnand %p814_p1, %p811_p0 }
   0x8   :  { %819 = shalt.err (!%p816_p2)
}
   0x9   :  { %s820_s30 = scalar_lea.vmem %s32_s22, 3456  ;;  %p825_p4 = scmp.lt.s32.totalorder %s32_s22, %s32_s22 }
   0xa   :  { %p821_p3 = scmp.ne.s32.totalorder %s32_s22, %s820_s30  ;;  %p826_p5 = scmp.lt.s32.totalorder %s820_s30, %s820_s30 }
   0xc   :  { %p827_p6 = por %p826_p5, %p825_p4 }
   0xe   :  { %p828_p7 = pnand %p827_p6, %p821_p3 }
  0x10   :  { %831 = shalt.err (!%p828_p7)
}
  0x11   :  { %s905_s7 = smov 384   ;;  %s906_s8 = smov 24  }
  0x12   :  { %37 = dma.hbm_to_vmem [thread:$0]  %s1133_s1, 3456, %s32_s22, [#allocation6], %s905_s7, %s905_s7, %s906_s8  }
  0x13   :  { %s907_s11 = smov [#allocation2]   ;;  %s832_s15 = scalar_lea.hbm %s1132_s0, 128 }
  0x14   :  { %s19_s12 = sshll.u32 %s907_s11, 4  ;;  %p833_p8 = scmp.ne.s32.totalorder %s1132_s0, %s832_s15  ;;  %s20_s12 = int_to_ptr.vmem [resolvable:$true] %s19_s12 }
  0x15   :  { %p836_p9 = scmp.lt.u32.totalorder %s832_s15, %s1132_s0 }
  0x17   :  { %p838_p10 = pnand %p836_p9, %p833_p8 }
  0x19   :  { %841 = shalt.err (!%p838_p10)
}
  0x1a   :  { %s842_s20 = scalar_lea.vmem %s20_s12, 128  ;;  %p847_p12 = scmp.lt.s32.totalorder %s20_s12, %s20_s12 }
  0x1b   :  { %p843_p11 = scmp.ne.s32.totalorder %s20_s12, %s842_s20  ;;  %p848_p13 = scmp.lt.s32.totalorder %s842_s20, %s842_s20 }
  0x1d   :  { %p849_p0 = por %p848_p13, %p847_p12 }
  0x1f   :  { %p850_p1 = pnand %p849_p0, %p843_p11 }
  0x21   :  { %853 = shalt.err (!%p850_p1)
}
  0x22   :  { %s908_s1 = smov 64   ;;  %s909_s21 = smov 4  }
  0x23   :  { %25 = dma.hbm_to_vmem [thread:$0]  %s1132_s0, 128, %s20_s12, [#allocation3], %s908_s1, %s908_s1, %s909_s21  }
  0x24   :  { %s910_s24 = smov [#allocation7]   ;;  %s854_s28 = scalar_lea.hbm %s1134_s2, 384 }
  0x25   :  { %s44_s25 = sshll.u32 %s910_s24, 4  ;;  %p855_p2 = scmp.ne.s32.totalorder %s1134_s2, %s854_s28  ;;  %s45_s25 = int_to_ptr.vmem [resolvable:$true] %s44_s25 }
  0x26   :  { %s856_s11 = scalar_lea.hbm %s1134_s2, 24576  ;;  %p858_p4 = scmp.lt.u32.totalorder %s854_s28, %s1134_s2 }
  0x27   :  { %p857_p3 = scmp.lt.u32.totalorder %s856_s11, %s854_s28 }
  0x29   :  { %p859_p5 = por %p858_p4, %p857_p3 }
  0x2b   :  { %p860_p6 = pnand %p859_p5, %p855_p2 }
  0x2d   :  { %863 = shalt.err (!%p860_p6)
}
  0x2e   :  { %s864_s0 = scalar_lea.vmem %s45_s25, 384  ;;  %p869_p8 = scmp.lt.s32.totalorder %s45_s25, %s45_s25 }
  0x2f   :  { %p865_p7 = scmp.ne.s32.totalorder %s45_s25, %s864_s0  ;;  %p870_p9 = scmp.lt.s32.totalorder %s864_s0, %s864_s0 }
  0x31   :  { %p871_p10 = por %p870_p9, %p869_p8 }
  0x33   :  { %p872_p11 = pnand %p871_p10, %p865_p7 }
  0x35   :  { %875 = shalt.err (!%p872_p11)
}
  0x36   :  { %47 = dma.hbm_to_vmem [thread:$0]  %s1134_s2, 384, %s45_s25, [#allocation6]  }
  0x37   :  { %898 = dma.done.wait [#allocation3], 128  }
  0x38   :  { %899 = vsyncadd [#allocation3], 4294967168 }
  0x39   :  { %900 = dma.done.wait [#allocation6], 3840  }
  0x3a   :  { %901 = vsyncadd [#allocation6], 4294963456  ;;  %v911_v0 = vmov 0   ;;  %v763_v1 = vld [vmem:[#allocation5 + $0x4] ss:$24 sps:$4 sm:$0xff]   ;;  %vm246_vm0 = vcmask 1041408   ;;  %v402_v44 = vlaneseq }
  0x3b   :  { %300 = vmatprep.mubr.bf16.mxu0 %v911_v0  ;;  %343 = vmatprep.mubr.bf16.mxu1 %v911_v0  ;;  %v765_v2 = vld [vmem:[#allocation5] ss:$24 sps:$4 sm:$0xff]   ;;  %v766_v3 = vld [vmem:[#allocation5 + $0xc] ss:$24 sps:$4 sm:$0xff]   ;;  %v771_v6 = vld [vmem:[#allocation5 + $0x30] ss:$24 sps:$4 sm:$0xff]  }
  0x3c   :  { %268 = vmatprep.subr.bf16.mxu0 %v763_v1  ;;  %v768_v4 = vld [vmem:[#allocation5 + $0x34] ss:$24 sps:$4 sm:$0xff]   ;;  %v770_v5 = vld [vmem:[#allocation5 + $0x8] ss:$24 sps:$4 sm:$0xff]   ;;  %311 = vmatprep.subr.bf16.mxu1 %v766_v3  ;;  %v774_v8 = vld [vmem:[#allocation5 + $0x64] ss:$24 sps:$4 sm:$0xff]  }
  0x3d   :  { %269 = vmatpush1.bf16.msra.mxu0 %v765_v2  ;;  %v772_v7 = vld [vmem:[#allocation5 + $0x3c] ss:$24 sps:$4 sm:$0xff]   ;;  %312 = vmatpush1.bf16.msra.mxu1 %v770_v5  ;;  %vm247_vm1 = vcmask 1042432   ;;  %v776_v9 = vld [vmem:[#allocation5 + $0x38] ss:$24 sps:$4 sm:$0xff]   ;;  %v912_v11 = vmov 65535  }
  0x3e   :  { %270 = vmatprep.subr.bf16.mxu0 %v768_v4  ;;  %313 = vmatprep.subr.bf16.mxu1 %v772_v7  ;;  %v777_v10 = vld [vmem:[#allocation5 + $0x60] ss:$24 sps:$4 sm:$0xff]   ;;  %v248_v12 = vsel %vm246_vm0, 4294967295, %v912_v11  ;;  %v778_v13 = vld [vmem:[#allocation5 + $0x6c] ss:$24 sps:$4 sm:$0xff]   ;;  %vm242_vm2 = vcmask 564224  }
  0x3f   :  { %v780_v14 = vld [vmem:[#allocation5 + $0x94] ss:$24 sps:$4 sm:$0xff]   ;;  %v782_v15 = vld [vmem:[#allocation5 + $0x68] ss:$24 sps:$4 sm:$0xff]   ;;  %v249_v16 = vsel %vm247_vm1, %v248_v12, 0  ;;  %v790_v31 = vld [vmem:[#allocation2] sm:$0xff]  }
  0x40   :  { %v783_v17 = vld [vmem:[#allocation5 + $0x90] ss:$24 sps:$4 sm:$0xff]   ;;  %v784_v18 = vld [vmem:[#allocation5 + $0x9c] ss:$24 sps:$4 sm:$0xff]   ;;  %v90_v19 = vld [vmem:[#allocation5 + $0xc0] sm:$0x77] }
  0x41   :  { %271 = vmatpush1.bf16.msra.mxu0 %v771_v6  ;;  %314 = vmatpush1.bf16.msra.mxu1 %v776_v9  ;;  %v733_v20 = vcombine.high %v90_v19, %v90_v19  ;;  %v732_v21 = vcombine.low %v90_v19, %v90_v19  ;;  %v91_v22 = vld [vmem:[#allocation5 + $0xc8] sm:$0x77]  ;;  %v787_v25 = vld [vmem:[#allocation5 + $0x98] ss:$24 sps:$4 sm:$0xff]   ;;  %v797_v33 = vld [vmem:[#allocation5 + $0x44] ss:$24 sps:$4 sm:$0xff]  }
  0x42   :  { %272 = vmatprep.subr.bf16.mxu0 %v774_v8  ;;  %315 = vmatprep.subr.bf16.mxu1 %v778_v13  ;;  %v735_v23 = vcombine.high %v91_v22, %v91_v22  ;;  %v734_v26 = vcombine.low %v91_v22, %v91_v22  ;;  %v794_v29 = vld [vmem:[#allocation5 + $0x14] ss:$24 sps:$4 sm:$0xff]   ;;  %v792_v32 = vld [vmem:[#allocation5 + $0x10] ss:$24 sps:$4 sm:$0xff]   ;;  %v795_v34 = vld [vmem:[#allocation5 + $0x40] ss:$24 sps:$4 sm:$0xff]  }
  0x43   :  { %v254_v24 = vand.u32 %v733_v20, %v249_v16  ;;  %v251_v28 = vand.u32 %v732_v21, %v249_v16  ;;  %v800_v35 = vld [vmem:[#allocation5 + $0x74] ss:$24 sps:$4 sm:$0xff]   ;;  %v798_v37 = vld [vmem:[#allocation5 + $0x70] ss:$24 sps:$4 sm:$0xff]   ;;  %v803_v38 = vld [vmem:[#allocation5 + $0xa4] ss:$24 sps:$4 sm:$0xff]  }
  0x44   :  { %v260_v27 = vand.u32 %v735_v23, %v249_v16  ;;  %v257_v30 = vand.u32 %v734_v26, %v249_v16  ;;  %v92_v36 = vld [vmem:[#allocation5 + $0xd0] sm:$0x77]  ;;  %v801_v40 = vld [vmem:[#allocation5 + $0xa0] ss:$24 sps:$4 sm:$0xff]   ;;  %v994_v45 = vshrl.u32 %v402_v44, 7 }
  0x45   :  { %273 = vmatpush1.bf16.msra.mxu0 %v777_v10  ;;  %316 = vmatpush1.bf16.msra.mxu1 %v782_v15  ;;  %v737_v39 = vcombine.high %v92_v36, %v92_v36  ;;  %v736_v41 = vcombine.low %v92_v36, %v92_v36  ;;  %v397_v46 = vld [vmem:[%s1135_s3] sm:$0x3f]  ;;  %v94_v59 = vld [vmem:[#allocation7 + $0x8] sm:$0xff] }
  0x46   :  { %274 = vmatprep.subr.bf16.mxu0 %v780_v14  ;;  %317 = vmatprep.subr.bf16.mxu1 %v784_v18  ;;  %v398_v47 = vunpack.c.l.bf16 %v397_v46  ;;  %v1000_v48 = vsub.s32 0, %v994_v45  ;;  %v1003_v49 = vsub.s32 2, %v994_v45  ;;  %v93_v50 = vld [vmem:[#allocation7] sm:$0xff]  ;;  %v1007_v53 = vsub.s32 4, %v994_v45 }
  0x47   :  { %v266_v42 = vand.u32 %v737_v39, %v249_v16  ;;  %v263_v43 = vand.u32 %v736_v41, %v249_v16  ;;  %v96_v54 = vunpack.c.l.bf16 %v93_v50  ;;  %v97_v55 = vunpack.c.h.bf16 %v93_v50 }
  0x48   :  { %v405_v52 = vrot.slane %v398_v47, %v1000_v48  ;;  %v409_v57 = vrot.slane %v398_v47, %v1003_v49  ;;  %v416_v1 = vsub.s32 6, %v994_v45  ;;  %v98_v6 = vunpack.c.l.bf16 %v94_v59 }
  0x49   :  { %275 = vmatpush1.bf16.msra.mxu0 %v783_v17  ;;  %318 = vmatpush1.bf16.msra.mxu1 %v787_v25  ;;  %v99_v15 = vunpack.c.h.bf16 %v94_v59  ;;  %v399_v19 = vunpack.c.h.bf16 %v397_v46 }
  0x4a   :  { %276 = vmatprep.subr.bf16.mxu0 %v254_v24  ;;  %319 = vmatprep.subr.bf16.mxu1 %v260_v27  ;;  %v435_v63 = vrot.slane %v405_v52, %v1000_v48  ;;  %v439_v5 = vrot.slane %v409_v57, %v1000_v48  ;;  %v417_v11 = vrot.slane %v398_v47, %v416_v1 }
  0x4c   :  { %v447_v20 = vrot.slane %v417_v11, %v1000_v48 }
  0x4d   :  { %277 = vmatpush1.bf16.msra.mxu0 %v251_v28  ;;  %320 = vmatpush1.bf16.msra.mxu1 %v257_v30 }
  0x4e   :  { %354 = vmatprep.subr.bf16.mxu0 %v794_v29  ;;  %v95_v29 = vld [vmem:[#allocation7 + $0x10] sm:$0xff] }
  0x4f   :  { %v100_v36 = vunpack.c.l.bf16 %v95_v29  ;;  %v101_v41 = vunpack.c.h.bf16 %v95_v29 }
  0x50   :  { %738 = vmatmul.mubr.msk.bf16.vlgmr.msra.gmra.mrb[0].mxu0 %vm242_vm2, %v790_v31  ;;  %739 = vmatmul.mubr.msk.bf16.vlgmr.msra.gmra.mrb[0].mxu1 %vm242_vm2, %v790_v31 }
  0x51   :  { %355 = vmatpush1.bf16.msra.mxu0 %v792_v32  ;;  %386 = vmatprep.mubr.bf16.mxu0 %v911_v0  ;;  %v413_v0 = vrot.slane %v398_v47, %v1007_v53 }
  0x52   :  { %356 = vmatprep.subr.bf16.mxu0 %v797_v33  ;;  %v425_v33 = vrot.slane %v399_v19, %v1003_v49 }
  0x53   :  { %v443_v10 = vrot.slane %v413_v0, %v1000_v48 }
  0x54   :  { %v455_v47 = vrot.slane %v425_v33, %v1000_v48 }
  0x55   :  { %357 = vmatpush1.bf16.msra.mxu0 %v795_v34 }
  0x56   :  { %358 = vmatprep.subr.bf16.mxu0 %v800_v35 }
  0x59   :  { %359 = vmatpush1.bf16.msra.mxu0 %v798_v37 }
  0x5a   :  { %360 = vmatprep.subr.bf16.mxu0 %v803_v38 }
  0x5d   :  { %361 = vmatpush1.bf16.msra.mxu0 %v801_v40 }
  0x5e   :  { %362 = vmatprep.subr.bf16.mxu0 %v266_v42 }
  0x61   :  { %363 = vmatpush1.bf16.msra.mxu0 %v263_v43 }
  0x64   :  { %740 = vmatmul.mubr.msk.bf16.vlgmr.msra.gmra.mrb[4].mxu0 %vm242_vm2, %v790_v31  ;;  %v421_v31 = vrot.slane %v399_v19, %v1000_v48 }
  0x66   :  { %v451_v42 = vrot.slane %v421_v31, %v1000_v48 }
 0x123   :  { %v302_v51 = vpop.f32.mrb[0].mxu0  ;;  %v345_v60 = vpop.f32.mrb[0].mxu1 }
 0x124   :  { %v304_v56 = vpop.f32.mrb[1].mxu0  ;;  %v347_v62 = vpop.f32.mrb[1].mxu1  ;;  %v303_v3 = vadd.f32 %v302_v51, %v96_v54  ;;  %v346_v14 = vadd.f32 %v345_v60, %v98_v6 }
 0x125   :  { %v306_v58 = vpop.f32.mrb[2].mxu0  ;;  %v349_v2 = vpop.f32.mrb[2].mxu1  ;;  %v305_v4 = vadd.f32 %v304_v56, %v97_v55  ;;  %v348_v24 = vadd.f32 %v347_v62, %v99_v15 }
 0x126   :  { %v308_v61 = vpop.f32.mrb[3].mxu0  ;;  %v351_v7 = vpop.f32.mrb[3].mxu1  ;;  %v307_v8 = vadd.f32 %v306_v58, %v96_v54  ;;  %v1015_v12 = vadd.f32 %v435_v63, %v303_v3  ;;  %v350_v18 = vadd.f32 %v349_v2, %v98_v6  ;;  %v1028_v23 = vadd.f32 %v443_v10, %v346_v14 }
 0x127   :  { %v309_v9 = vadd.f32 %v308_v61, %v97_v55  ;;  %v1017_v13 = vadd.f32 %v439_v5, %v305_v4  ;;  %v352_v28 = vadd.f32 %v351_v7, %v99_v15  ;;  %v1044_v35 = vadd.f32 %v447_v20, %v348_v24 }
 0x128   :  { %v1019_v16 = vadd.f32 %v435_v63, %v307_v8  ;;  %v485_v21 = vmul.f32 %v1015_v12, %v1015_v12  ;;  %v1034_v27 = vadd.f32 %v443_v10, %v350_v18  ;;  %v487_v34 = vmul.f32 %v1028_v23, %v1028_v23 }
 0x129   :  { %v1021_v17 = vadd.f32 %v439_v5, %v309_v9  ;;  %v486_v22 = vmul.f32 %v1017_v13, %v1017_v13  ;;  %v468_v30 = vadd.f32 %v1017_v13, %v1015_v12  ;;  %v1048_v40 = vadd.f32 %v447_v20, %v352_v28 }
 0x12a   :  { %v491_v25 = vmul.f32 %v1019_v16, %v1019_v16  ;;  %v493_v39 = vmul.f32 %v1034_v27, %v1034_v27  ;;  %v488_v52 = vmul.f32 %v1044_v35, %v1044_v35 }
 0x12b   :  { %v492_v26 = vmul.f32 %v1021_v17, %v1021_v17  ;;  %v475_v32 = vadd.f32 %v1021_v17, %v1019_v16  ;;  %v497_v37 = vadd.f32 %v486_v22, %v485_v21  ;;  %v469_v43 = vadd.f32 %v468_v30, %v1028_v23 }
 0x12c   :  { %v494_v55 = vmul.f32 %v1048_v40, %v1048_v40 }
 0x12d   :  { %v504_v38 = vadd.f32 %v492_v26, %v491_v25  ;;  %v476_v44 = vadd.f32 %v475_v32, %v1034_v27  ;;  %v498_v54 = vadd.f32 %v497_v37, %v487_v34  ;;  %v470_v62 = vadd.f32 %v469_v43, %v1044_v35 }
 0x12f   :  { %v505_v58 = vadd.f32 %v504_v38, %v493_v39  ;;  %v477_v1 = vadd.f32 %v476_v44, %v1048_v40  ;;  %v499_v5 = vadd.f32 %v498_v54, %v488_v52  ;;  %v555_v44 = vsub.s32 1, %v994_v45 }
 0x131   :  { %v506_v8 = vadd.f32 %v505_v58, %v494_v55 }
 0x137   :  { %v388_v46 = vpop.f32.mrb[4].mxu0 }
 0x138   :  { %v389_v50 = vadd.f32 %v388_v46, %v100_v36  ;;  %v390_v51 = vpop.f32.mrb[5].mxu0  ;;  %v563_v46 = vsub.s32 3, %v994_v45 }
 0x139   :  { %v391_v56 = vadd.f32 %v390_v51, %v101_v41  ;;  %v392_v57 = vpop.f32.mrb[6].mxu0 }
 0x13a   :  { %v1058_v59 = vadd.f32 %v451_v42, %v389_v50  ;;  %v393_v60 = vadd.f32 %v392_v57, %v100_v36  ;;  %v394_v61 = vpop.f32.mrb[7].mxu0 }
 0x13b   :  { %v1061_v63 = vadd.f32 %v455_v47, %v391_v56  ;;  %v395_v0 = vadd.f32 %v394_v61, %v101_v41  ;;  %v547_v41 = vld [vmem:[%s1136_s4] sm:$0x3f]  ;;  %s913_s4 = smov [#allocation8]  }
 0x13c   :  { %v1064_v2 = vadd.f32 %v451_v42, %v393_v60  ;;  %v471_v3 = vadd.f32 %v470_v62, %v1058_v59  ;;  %v489_v4 = vmul.f32 %v1058_v59, %v1058_v59  ;;  %v591_v42 = vld [vmem:[%s1137_s5] sm:$0x3f]  ;;  %v560_v50 = vrot.slane %v547_v41, %v1003_v49  ;;  %s694_s5 = sshll.u32 %s913_s4, 4  ;;  %s695_s5 = int_to_ptr.vmem [resolvable:$true] %s694_s5 }
 0x13d   :  { %v1069_v6 = vadd.f32 %v455_v47, %v395_v0  ;;  %v490_v7 = vmul.f32 %v1061_v63, %v1061_v63  ;;  %v571_v47 = vsub.s32 5, %v994_v45  ;;  %v568_v51 = vrot.slane %v547_v41, %v1007_v53  ;;  %s876_s20 = scalar_lea.vmem %s695_s5, 768  ;;  %p881_p13 = scmp.lt.s32.totalorder %s695_s5, %s695_s5 }
 0x13e   :  { %v472_v9 = vadd.f32 %v471_v3, %v1061_v63  ;;  %v500_v10 = vadd.f32 %v499_v5, %v489_v4  ;;  %v478_v11 = vadd.f32 %v477_v1, %v1064_v2  ;;  %v495_v14 = vmul.f32 %v1064_v2, %v1064_v2  ;;  %p877_p12 = scmp.ne.s32.totalorder %s695_s5, %s876_s20  ;;  %p882_p0 = scmp.lt.s32.totalorder %s876_s20, %s876_s20 }
 0x13f   :  { %v496_v18 = vmul.f32 %v1069_v6, %v1069_v6  ;;  %v612_v52 = vrot.slane %v591_v42, %v1007_v53  ;;  %v552_v54 = vrot.slane %v547_v41, %v1000_v48  ;;  %v556_v55 = vrot.slane %v547_v41, %v555_v44 }
 0x140   :  { %473 = vadd.xlane.f32.xlu0 %v472_v9  ;;  %v501_v15 = vadd.f32 %v500_v10, %v490_v7  ;;  %v507_v19 = vadd.f32 %v506_v8, %v495_v14  ;;  %v479_v20 = vadd.f32 %v478_v11, %v1069_v6  ;;  %v564_v56 = vrot.slane %v547_v41, %v563_v46  ;;  %p883_p1 = por %p882_p0, %p881_p13 }
 0x141   :  { %v572_v57 = vrot.slane %v547_v41, %v571_v47  ;;  %v596_v58 = vrot.slane %v591_v42, %v1000_v48  ;;  %v600_v60 = vrot.slane %v591_v42, %v555_v44  ;;  %v604_v61 = vrot.slane %v591_v42, %v1003_v49 }
 0x142   :  { %502 = vadd.xlane.f32.xlu1 %v501_v15  ;;  %v508_v21 = vadd.f32 %v507_v19, %v496_v18  ;;  %v608_v62 = vrot.slane %v591_v42, %v563_v46  ;;  %v616_v0 = vrot.slane %v591_v42, %v571_v47  ;;  %p884_p2 = pnand %p883_p1, %p877_p12 }
 0x144   :  { %480 = vadd.xlane.f32.xlu0 %v479_v20 }
 0x146   :  { %509 = vadd.xlane.f32.xlu1 %v508_v21 }
 0x1cd   :  { %v474_v22 = vpop.xlane.xlu0 %473 }
 0x1ce   :  { %v483_v24 = vmul.f32 0.0013020834, %v474_v22 }
 0x1cf   :  { %v503_v25 = vpop.xlane.xlu1 %502 }
 0x1d0   :  { %v511_v26 = vmul.f32 0.0013020834, %v503_v25  ;;  %v513_v28 = vmul.f32 %v483_v24, %v483_v24  ;;  %v523_v45 = vsub.f32 %v1015_v12, %v483_v24  ;;  %v524_v1 = vsub.f32 %v1017_v13, %v483_v24 }
 0x1d1   :  { %v481_v29 = vpop.xlane.xlu0 %480  ;;  %v525_v3 = vsub.f32 %v1028_v23, %v483_v24  ;;  %v526_v53 = vsub.f32 %v1044_v35, %v483_v24  ;;  %v527_v5 = vsub.f32 %v1058_v59, %v483_v24  ;;  %v528_v7 = vsub.f32 %v1061_v63, %v483_v24 }
 0x1d2   :  { %v1080_v30 = vmul.f32 0.0013020834, %v481_v29  ;;  %v515_v31 = vsub.f32 %v511_v26, %v513_v28 }
 0x1d3   :  { %v510_v32 = vpop.xlane.xlu1 %509 }
 0x1d4   :  { %v517_v33 = vmax.f32 %v515_v31, 0.0  ;;  %v512_v34 = vmul.f32 0.0013020834, %v510_v32  ;;  %v514_v36 = vmul.f32 %v1080_v30, %v1080_v30  ;;  %v529_v48 = vsub.f32 %v1019_v16, %v1080_v30 }
 0x1d5   :  { %v530_v49 = vsub.f32 %v1021_v17, %v1080_v30  ;;  %v531_v13 = vsub.f32 %v1034_v27, %v1080_v30  ;;  %v532_v23 = vsub.f32 %v1048_v40, %v1080_v30  ;;  %v533_v16 = vsub.f32 %v1064_v2, %v1080_v30 }
 0x1d6   :  { %v519_v37 = vadd.f32 1e-12, %v517_v33  ;;  %v516_v38 = vsub.f32 %v512_v34, %v514_v36  ;;  %v534_v17 = vsub.f32 %v1069_v6, %v1080_v30 }
 0x1d8   :  { %806 = vrsqrt.f32 %v519_v37  ;;  %v518_v39 = vmax.f32 %v516_v38, 0.0 }
 0x1da   :  { %v520_v43 = vadd.f32 1e-12, %v518_v39 }
 0x1dc   :  { %808 = vrsqrt.f32 %v520_v43 }
 0x1e2   :  { %v807_v4 = vpop.eup %806 }
 0x1e3   :  { %v535_v8 = vmul.f32 %v807_v4, %v523_v45  ;;  %v536_v9 = vmul.f32 %v807_v4, %v524_v1  ;;  %v537_v12 = vmul.f32 %v807_v4, %v525_v3  ;;  %v538_v10 = vmul.f32 %v807_v4, %v526_v53 }
 0x1e4   :  { %v539_v35 = vmul.f32 %v807_v4, %v527_v5  ;;  %v540_v59 = vmul.f32 %v807_v4, %v528_v7 }
 0x1e5   :  { %v579_v11 = vmul.f32 %v552_v54, %v535_v8  ;;  %v580_v63 = vmul.f32 %v556_v55, %v536_v9  ;;  %v581_v14 = vmul.f32 %v560_v50, %v537_v12  ;;  %v582_v15 = vmul.f32 %v564_v56, %v538_v10 }
 0x1e6   :  { %v583_v18 = vmul.f32 %v568_v51, %v539_v35  ;;  %v584_v19 = vmul.f32 %v572_v57, %v540_v59  ;;  %v809_v20 = vpop.eup %808 }
 0x1e7   :  { %v623_v21 = vadd.f32 %v596_v58, %v579_v11  ;;  %v624_v27 = vadd.f32 %v600_v60, %v580_v63  ;;  %v625_v22 = vadd.f32 %v604_v61, %v581_v14  ;;  %v626_v24 = vadd.f32 %v608_v62, %v582_v15 }
 0x1e8   :  { %v541_v40 = vmul.f32 %v809_v20, %v529_v48  ;;  %v542_v25 = vmul.f32 %v809_v20, %v530_v49  ;;  %v543_v26 = vmul.f32 %v809_v20, %v531_v13  ;;  %v544_v28 = vmul.f32 %v809_v20, %v532_v23 }
 0x1e9   :  { %v545_v29 = vmul.f32 %v809_v20, %v533_v16  ;;  %v546_v31 = vmul.f32 %v809_v20, %v534_v17  ;;  %v627_v32 = vadd.f32 %v612_v52, %v583_v18  ;;  %v628_v33 = vadd.f32 %v616_v0, %v584_v19 }
 0x1ea   :  { %v585_v34 = vmul.f32 %v552_v54, %v541_v40  ;;  %v586_v2 = vmul.f32 %v556_v55, %v542_v25  ;;  %v587_v36 = vmul.f32 %v560_v50, %v543_v26  ;;  %v588_v37 = vmul.f32 %v564_v56, %v544_v28 }
 0x1eb   :  { %v589_v6 = vmul.f32 %v568_v51, %v545_v29  ;;  %v590_v30 = vmul.f32 %v572_v57, %v546_v31  ;;  %v747_v38 = vpack.c.bf16 %v624_v27, %v623_v21  ;;  %v748_v39 = vpack.c.bf16 %v626_v24, %v625_v22 }
 0x1ec   :  { %v629_v41 = vadd.f32 %v596_v58, %v585_v34  ;;  %v630_v42 = vadd.f32 %v600_v60, %v586_v2  ;;  %v631_v43 = vadd.f32 %v604_v61, %v587_v36  ;;  %v632_v44 = vadd.f32 %v608_v62, %v588_v37 }
 0x1ed   :  { %v633_v46 = vadd.f32 %v612_v52, %v589_v6  ;;  %v634_v47 = vadd.f32 %v616_v0, %v590_v30  ;;  %v749_v45 = vpack.c.bf16 %v628_v33, %v627_v32  ;;  %683 = vst [vmem:[#allocation8] sm:$0xff] %v747_v38  ;;  %684 = vst [vmem:[#allocation8 + $0x8] sm:$0xff] %v748_v39 }
 0x1ee   :  { %v750_v1 = vpack.c.bf16 %v630_v42, %v629_v41  ;;  %v751_v54 = vpack.c.bf16 %v632_v44, %v631_v43 }
 0x1ef   :  { %v752_v55 = vpack.c.bf16 %v634_v47, %v633_v46  ;;  %685 = vst [vmem:[#allocation8 + $0x10] sm:$0xff] %v749_v45 }
 0x1f0   :  { %686 = vst [vmem:[#allocation8 + $0x18] sm:$0xff] %v750_v1  ;;  %687 = vst [vmem:[#allocation8 + $0x20] sm:$0xff] %v751_v54 }
 0x1f1   :  { %688 = vst [vmem:[#allocation8 + $0x28] sm:$0xff] %v752_v55 }
 0x1f2   :  { %887 = shalt.err (!%p884_p2)
}
 0x1f3   :  { %s888_s22 = scalar_lea.hbm %s1138_s6, 768 }
 0x1f4   :  { %p889_p3 = scmp.ne.s32.totalorder %s1138_s6, %s888_s22  ;;  %p892_p4 = scmp.lt.u32.totalorder %s888_s22, %s1138_s6 }
 0x1f6   :  { %p894_p5 = pnand %p892_p4, %p889_p3 }
 0x1f8   :  { %897 = shalt.err (!%p894_p5)
}
 0x1f9   :  { %700 = dma.vmem_to_hbm [thread:$0]  %s695_s5, 768, %s1138_s6, [#allocation4], %s905_s7, %s905_s7, %s906_s8  }
 0x1fa   :  { %902 = dma.done.wait [#allocation4], 768  }
 0x1fb   :  { %903 = vsyncadd [#allocation4], 4294966528 }
 0x1fc   :  { %704 = vsyncpa [#allocation3], 1 }
 0x1fd   :  { %705 = vsyncpa [#allocation6], 1 }
 0x1fe   :  { %706 = vsyncpa [#allocation4], 1 }

</bundles_post_ra>
